<compile_context>
chip_gen: v7x
topology: tpu7x:2x2x1
jax: 0.10.0
libtpu: 0.0.40
codegen_flags: <defaults>
</compile_context>

<pallas_src>
import functools

import jax
import jax.numpy as jnp
from jax import lax
from jax.experimental import pallas as pl
from jax.experimental.pallas import tpu as pltpu


def _round_up(x, m):
    return (x + m - 1) // m * m


def _cdiv(a, b):
    return -(-a // b)


def _num_tensorcores():
    try:
        kind = jax.devices()[0].device_kind.lower()
        if "v7" in kind:
            return 2
    except Exception:
        pass
    return 1


def _vmem_capacity_bytes():
    try:
        return int(pltpu.get_tpu_info().vmem_capacity_bytes)
    except Exception:
        return 64 << 20  # conservative (v7x-sized) fallback


def _lstm_tail_kernel(gx_ref, whh_ref, gfix_ref, wlin_ref, blin_ref, out_ref,
                      h_scr, c_scr, *, unroll):
    """One (batch-block, time-chunk) grid step of the LSTM recurrence + final Linear.

    gx_ref   : (TC, TB, 4H) bf16  precomputed x_t @ W_ih^T + b (time-major,
                                  g-gate columns pre-scaled by 2)
    whh_ref  : (H, 4H)      bf16  hidden->gates weights (transposed, g cols *2)
    gfix_ref : (2, 4H)      f32   row0 = gate scale (2 on g lanes, 1 else)
                                  row1 = gate offset (-1 on g lanes, 0 else)
    wlin_ref : (H, OUT_PAD) bf16  final linear weights (transposed, lane-padded)
    blin_ref : (1, OUT_PAD) f32   final linear bias (lane-padded)
    out_ref  : (TB, OUT_PAD)      written only on the last time chunk
    h_scr    : (TB, H) bf16       recurrent hidden state carried across time chunks
    c_scr    : (TB, H) f32        recurrent cell state carried across time chunks
    """
    TC = gx_ref.shape[0]
    H = whh_ref.shape[0]
    tc = pl.program_id(1)

    @pl.when(tc == 0)
    def _init():
        h_scr[...] = jnp.zeros_like(h_scr)
        c_scr[...] = jnp.zeros_like(c_scr)

    # Loaded once per chunk; single-sigmoid gate fixup rows (broadcast over sublanes).
    g_scale = gfix_ref[0:1, :]    # (1, 4H)
    g_offset = gfix_ref[1:2, :]   # (1, 4H)

    def step(t, carry):
        h, c = carry                                              # h bf16, c f32
        gates = gx_ref[t].astype(jnp.float32) + jnp.dot(
            h, whh_ref[...], preferred_element_type=jnp.float32)  # (TB, 4H) f32
        # One EUP pass: sigmoid everywhere; g lanes become tanh via 2*sigmoid(2z)-1
        # (the 2z pre-scale is already folded into the weights / gx).
        act = jax.nn.sigmoid(gates) * g_scale + g_offset
        i_g = act[:, 0 * H:1 * H]
        f_g = act[:, 1 * H:2 * H]
        g_g = act[:, 2 * H:3 * H]
        o_g = act[:, 3 * H:4 * H]
        c_new = f_g * c + i_g * g_g
        h_new = (o_g * jnp.tanh(c_new)).astype(jnp.bfloat16)
        return (h_new, c_new)

    # State stays in vregs across the (unrolled) chunk; spill once per chunk.
    h_n, c_n = lax.fori_loop(0, TC, step, (h_scr[...], c_scr[...]), unroll=unroll)
    h_scr[...] = h_n
    c_scr[...] = c_n

    @pl.when(tc == pl.num_programs(1) - 1)
    def _finalize():
        out_ref[...] = (
            jnp.dot(h_n, wlin_ref[...], preferred_element_type=jnp.float32)
            + blin_ref[...]
        ).astype(out_ref.dtype)


def text_subnet_forward(x, params, *, max_time_chunk=128, max_batch_block=32):
    """x: (B, T, D_in) batch-first, like the PyTorch module. Returns (B, out_size)."""
    w_ih, w_hh, b_ih, b_hh, w_lin, b_lin = (
        params["w_ih"], params["w_hh"], params["b_ih"], params["b_hh"],
        params["w_lin"], params["b_lin"],
    )
    B, T, D_in = x.shape
    H = w_hh.shape[1]
    G = 4 * H
    out_size = w_lin.shape[0]
    OUT_PAD = _round_up(out_size, 128)          # lane-dense output store

    # ---- glue (plain JAX): gate-column pre-scale for the single-sigmoid trick -----
    ones_h = jnp.ones((H,), jnp.float32)
    col_scale = jnp.concatenate([ones_h, ones_h, 2.0 * ones_h, ones_h])   # (4H,)
    gfix = jnp.stack([col_scale, 1.0 - col_scale]).astype(jnp.float32)    # (2, 4H)

    wih_t = (jnp.transpose(w_ih) * col_scale).astype(jnp.bfloat16)        # (D_in, 4H)
    whh_t = (jnp.transpose(w_hh) * col_scale).astype(jnp.bfloat16)        # (H, 4H)
    bias = ((b_ih + b_hh) * col_scale).astype(jnp.float32)                # (4H,)

    # ---- time-major bf16 x, then ONE hoisted MXU input projection ------------------
    x_tm = jnp.transpose(x.astype(jnp.bfloat16), (1, 0, 2))               # (T, B, Din)
    gx = (jnp.einsum("tbd,dg->tbg", x_tm, wih_t,
                     preferred_element_type=jnp.float32) + bias
          ).astype(jnp.bfloat16)                                          # (T, B, 4H)

    # ---- batch block (parallel grid axis); >=2 blocks on multi-TC chips ------------
    B_pad = _round_up(B, 8)
    n_tc = _num_tensorcores()
    TB = min(max_batch_block, B_pad)
    if n_tc >= 2 and B_pad >= 16:
        TB = min(TB, _round_up(_cdiv(B_pad, n_tc), 8))
    B_pad = _round_up(B_pad, TB)
    if B_pad != B:
        gx = jnp.pad(gx, ((0, 0), (0, B_pad - B), (0, 0)))

    # ---- VMEM-aware time chunk; front-pad T with identity timesteps ----------------
    vmem_cap = _vmem_capacity_bytes()
    gx_budget = vmem_cap // 4                       # double-buffered gx chunk budget
    tc_by_vmem = max(1, gx_budget // (2 * TB * G * 2))
    TC = max(1, min(max_time_chunk, T, tc_by_vmem))
    T_pad = _round_up(T, TC)
    P = T_pad - T
    if P:
        # Identity steps: i-gate logit very negative -> i ~ 0 -> h = c = 0 preserved.
        pad_i = jnp.full((P, B_pad, H), -30.0, jnp.bfloat16)
        pad_rest = jnp.zeros((P, B_pad, 3 * H), jnp.bfloat16)
        gx = jnp.concatenate(
            [jnp.concatenate([pad_i, pad_rest], axis=-1), gx], axis=0)
    unroll = True if TC <= 16 else 8

    wlin_t = jnp.pad(jnp.transpose(w_lin).astype(jnp.bfloat16),
                     ((0, 0), (0, OUT_PAD - out_size)))    # (H, OUT_PAD) bf16
    blin = jnp.pad(b_lin.astype(jnp.float32),
                   (0, OUT_PAD - out_size)).reshape(1, OUT_PAD)

    grid = (B_pad // TB, T_pad // TC)

    # VMEM budget: bf16 double-buffered gx chunk + (double-buffered) resident weights
    # + output block + recurrent state scratch.
    vmem_needed = (
        2 * TC * TB * G * 2          # gx chunk (bf16, double-buffered)
        + 2 * H * G * 2              # whh (bf16)
        + 2 * 2 * G * 4              # gate fixup rows
        + 2 * H * OUT_PAD * 2        # wlin (bf16)
        + 2 * OUT_PAD * 4            # blin
        + 2 * TB * OUT_PAD * 4       # out block
        + TB * H * 2 + TB * H * 4    # h (bf16) + c (f32) scratch
    )
    compiler_params = pltpu.CompilerParams(
        dimension_semantics=("parallel", "arbitrary"),
        vmem_limit_bytes=int(min(vmem_needed + (8 << 20), vmem_cap)),
    )

    out_padded = pl.pallas_call(
        functools.partial(_lstm_tail_kernel, unroll=unroll),
        out_shape=jax.ShapeDtypeStruct((B_pad, OUT_PAD), x.dtype),
        grid_spec=pltpu.PrefetchScalarGridSpec(
            num_scalar_prefetch=0,
            grid=grid,
            in_specs=[
                pl.BlockSpec((TC, TB, G), lambda b, t: (t, b, 0)),
                pl.BlockSpec((H, G), lambda b, t: (0, 0)),
                pl.BlockSpec((2, G), lambda b, t: (0, 0)),
                pl.BlockSpec((H, OUT_PAD), lambda b, t: (0, 0)),
                pl.BlockSpec((1, OUT_PAD), lambda b, t: (0, 0)),
            ],
            out_specs=pl.BlockSpec((TB, OUT_PAD), lambda b, t: (b, 0)),
            scratch_shapes=[
                pltpu.VMEM((TB, H), jnp.bfloat16),   # h carried across time chunks
                pltpu.VMEM((TB, H), jnp.float32),    # c carried across time chunks
            ],
        ),
        compiler_params=compiler_params,
    )(gx, whh_t, gfix, wlin_t, blin)

    return out_padded[:B, :out_size]


def text_subnet_reference(x, params, *, emulate_bf16=True):
    """Pure-JAX reference (PyTorch module semantics). If emulate_bf16, operands and
    the streamed gate inputs are rounded to bf16 (matching the kernel numerics)."""
    w_ih, w_hh, b_ih, b_hh, w_lin, b_lin = (
        params["w_ih"], params["w_hh"], params["b_ih"], params["b_hh"],
        params["w_lin"], params["b_lin"],
    )
    B, T, _ = x.shape
    H = w_hh.shape[1]

    def rnd(a):
        return a.astype(jnp.bfloat16).astype(jnp.float32) if emulate_bf16 else a

    w_ih_r, w_hh_r, w_lin_r = rnd(w_ih), rnd(w_hh), rnd(w_lin)
    gx = jnp.einsum("btd,gd->btg", rnd(x), w_ih_r) + (b_ih + b_hh)
    gx = rnd(gx)                                           # kernel streams bf16 gx

    def step(carry, gx_t):
        h, c = carry
        gates = gx_t + rnd(h) @ w_hh_r.T
        i_g = jax.nn.sigmoid(gates[:, 0 * H:1 * H])
        f_g = jax.nn.sigmoid(gates[:, 1 * H:2 * H])
        g_g = jnp.tanh(gates[:, 2 * H:3 * H])
        o_g = jax.nn.sigmoid(gates[:, 3 * H:4 * H])
        c = f_g * c + i_g * g_g
        h = o_g * jnp.tanh(c)
        return (h, c), None

    h0 = jnp.zeros((B, H), jnp.float32)
    c0 = jnp.zeros((B, H), jnp.float32)
    (h_n, _), _ = lax.scan(step, (h0, c0), jnp.transpose(gx, (1, 0, 2)))
    return rnd(h_n) @ w_lin_r.T + b_lin


def init_params(key, in_size, hidden_size, out_size):
    ks = jax.random.split(key, 6)
    s = 1.0 / jnp.sqrt(hidden_size)
    return {
        "w_ih": jax.random.uniform(ks[0], (4 * hidden_size, in_size), jnp.float32, -s, s),
        "w_hh": jax.random.uniform(ks[1], (4 * hidden_size, hidden_size), jnp.float32, -s, s),
        "b_ih": jax.random.uniform(ks[2], (4 * hidden_size,), jnp.float32, -s, s),
        "b_hh": jax.random.uniform(ks[3], (4 * hidden_size,), jnp.float32, -s, s),
        "w_lin": jax.random.uniform(ks[4], (out_size, hidden_size), jnp.float32, -s, s),
        "b_lin": jax.random.uniform(ks[5], (out_size,), jnp.float32, -s, s),
    }


if __name__ == "__main__":
    B, T, IN_SIZE, HIDDEN, OUT = 4, 8, 16, 32, 8

    key = jax.random.PRNGKey(0)
    k_x, k_p = jax.random.split(key)
    x = jax.random.normal(k_x, (B, T, IN_SIZE), jnp.float32)
    params = init_params(k_p, IN_SIZE, HIDDEN, OUT)

    y = text_subnet_forward(x, params)
    y = jax.block_until_ready(y)
    assert y.shape == (B, OUT), y.shape

    # Tight check vs. a reference using the same bf16-rounded operands / gate inputs.
    y_ref_bf = text_subnet_reference(x, params, emulate_bf16=True)
    assert jnp.allclose(y, y_ref_bf, atol=3e-3, rtol=3e-3), (
        f"max abs err vs bf16-emulated ref: {jnp.max(jnp.abs(y - y_ref_bf))}"
    )
    # Loose sanity check vs. the pure-f32 reference (PyTorch semantics).
    y_ref_f32 = text_subnet_reference(x, params, emulate_bf16=False)
    assert jnp.allclose(y, y_ref_f32, atol=5e-2, rtol=5e-2), (
        f"max abs err vs f32 ref: {jnp.max(jnp.abs(y - y_ref_f32))}"
    )

    print("KERNEL_OK")
</pallas_src>

<mosaic_0001>
module attributes {stable_mosaic.version = 11 : i64} {
  func.func @_lstm_tail_kernel(%arg0: i32, %arg1: i32, %arg2: memref<8x8x128xbf16, #tpu.memory_space<vmem>>, %arg3: memref<32x128xbf16, #tpu.memory_space<vmem>>, %arg4: memref<2x128xf32, #tpu.memory_space<vmem>>, %arg5: memref<32x128xbf16, #tpu.memory_space<vmem>>, %arg6: memref<1x128xf32, #tpu.memory_space<vmem>>, %arg7: memref<8x128xf32, #tpu.memory_space<vmem>>, %arg8: memref<8x32xbf16, #tpu.memory_space<vmem>>, %arg9: memref<8x32xf32, #tpu.memory_space<vmem>>) attributes {dimension_semantics = [#tpu.dimension_semantics<parallel>, #tpu.dimension_semantics<arbitrary>], iteration_bounds = array<i64: 1, 1>, scalar_prefetch = 0 : i64, scratch_operands = 2 : i64, tpu.core_type = #tpu.core_type<tc>, window_params = [{transform_indices = @transform_0, window_bounds = array<i64: 8, 8, 128>}, {pipeline_mode = #tpu.pipeline_mode<synchronous>, transform_indices = @transform_1, window_bounds = array<i64: 32, 128>}, {pipeline_mode = #tpu.pipeline_mode<synchronous>, transform_indices = @transform_2, window_bounds = array<i64: 2, 128>}, {pipeline_mode = #tpu.pipeline_mode<synchronous>, transform_indices = @transform_3, window_bounds = array<i64: 32, 128>}, {pipeline_mode = #tpu.pipeline_mode<synchronous>, transform_indices = @transform_4, window_bounds = array<i64: 1, 128>}, {transform_indices = @transform_5, window_bounds = array<i64: 8, 128>}]} {
    %c0_i32 = arith.constant 0 : i32
    %0 = arith.cmpi eq, %arg1, %c0_i32 : i32
    %1 = arith.extui %0 : i1 to i32
    %c0_i32_0 = arith.constant 0 : i32
    %2 = arith.cmpi ne, %1, %c0_i32_0 : i32
    scf.if %2 {
      %cst_61 = arith.constant 0.000000e+00 : bf16
      %220 = vector.broadcast %cst_61 : bf16 to vector<8x32xbf16>
      %c0_62 = arith.constant 0 : index
      %c0_63 = arith.constant 0 : index
      %221 = vector.load %arg8[%c0_62, %c0_63] : memref<8x32xbf16, #tpu.memory_space<vmem>>, vector<8x32xbf16>
      tpu.vector_store %arg8[%c0_62, %c0_63], %220 {strides = array<i32>} : memref<8x32xbf16, #tpu.memory_space<vmem>>, vector<8x32xbf16>,
      %cst_64 = arith.constant 0.000000e+00 : f32
      %222 = vector.broadcast %cst_64 : f32 to vector<8x32xf32>
      %c0_65 = arith.constant 0 : index
      %c0_66 = arith.constant 0 : index
      %223 = vector.load %arg9[%c0_65, %c0_66] : memref<8x32xf32, #tpu.memory_space<vmem>>, vector<8x32xf32>
      tpu.vector_store %arg9[%c0_65, %c0_66], %222 {strides = array<i32>} : memref<8x32xf32, #tpu.memory_space<vmem>>, vector<8x32xf32>,
    } else {
    }
    %c0 = arith.constant 0 : index
    %c0_1 = arith.constant 0 : index
    %3 = vector.load %arg4[%c0, %c0_1] : memref<2x128xf32, #tpu.memory_space<vmem>>, vector<1x128xf32>
    %c1 = arith.constant 1 : index
    %c0_2 = arith.constant 0 : index
    %4 = vector.load %arg4[%c1, %c0_2] : memref<2x128xf32, #tpu.memory_space<vmem>>, vector<1x128xf32>
    %c0_3 = arith.constant 0 : index
    %c0_4 = arith.constant 0 : index
    %5 = vector.load %arg8[%c0_3, %c0_4] : memref<8x32xbf16, #tpu.memory_space<vmem>>, vector<8x32xbf16>
    %c0_5 = arith.constant 0 : index
    %c0_6 = arith.constant 0 : index
    %6 = vector.load %arg9[%c0_5, %c0_6] : memref<8x32xf32, #tpu.memory_space<vmem>>, vector<8x32xf32>
    %c0_i32_7 = arith.constant 0 : i32
    %7 = arith.index_cast %c0_i32_7 : i32 to index
    %c0_8 = arith.constant 0 : index
    %c0_9 = arith.constant 0 : index
    %8 = vector.load %arg2[%7, %c0_8, %c0_9] : memref<8x8x128xbf16, #tpu.memory_space<vmem>>, vector<1x8x128xbf16>
    %9 = vector.shape_cast %8 : vector<1x8x128xbf16> to vector<8x128xbf16>
    %10 = arith.extf %9 : vector<8x128xbf16> to vector<8x128xf32>
    %c0_10 = arith.constant 0 : index
    %c0_11 = arith.constant 0 : index
    %11 = vector.load %arg3[%c0_10, %c0_11] : memref<32x128xbf16, #tpu.memory_space<vmem>>, vector<32x128xbf16>
    %cst = arith.constant dense<0.000000e+00> : vector<8x128xf32>
    %12 = tpu.matmul %5, %11, %cst {dimension_numbers = #tpu.dot_dimension_numbers<[1], [0], [0], [1], [0, 0, 1, 1], [], []>} : vector<8x32xbf16>, vector<32x128xbf16>, vector<8x128xf32> -> vector<8x128xf32>
    %13 = arith.addf %10, %12 : vector<8x128xf32>
    %14 = arith.negf %13 : vector<8x128xf32>
    %15 = math.exp %14 : vector<8x128xf32>
    %cst_12 = arith.constant 1.000000e+00 : f32
    %16 = vector.broadcast %cst_12 : f32 to vector<8x128xf32>
    %17 = arith.addf %16, %15 : vector<8x128xf32>
    %18 = arith.divf %16, %17 : vector<8x128xf32>
    %19 = vector.broadcast %3 : vector<1x128xf32> to vector<8x128xf32>
    %20 = arith.mulf %18, %19 : vector<8x128xf32>
    %21 = vector.broadcast %4 : vector<1x128xf32> to vector<8x128xf32>
    %22 = arith.addf %20, %21 : vector<8x128xf32>
    %23 = vector.extract_strided_slice %22 {offsets = [0, 0], sizes = [8, 32], strides = [1, 1]} : vector<8x128xf32> to vector<8x32xf32>
    %24 = vector.extract_strided_slice %22 {offsets = [0, 32], sizes = [8, 32], strides = [1, 1]} : vector<8x128xf32> to vector<8x32xf32>
    %25 = vector.extract_strided_slice %22 {offsets = [0, 64], sizes = [8, 32], strides = [1, 1]} : vector<8x128xf32> to vector<8x32xf32>
    %26 = vector.extract_strided_slice %22 {offsets = [0, 96], sizes = [8, 32], strides = [1, 1]} : vector<8x128xf32> to vector<8x32xf32>
    %27 = arith.mulf %24, %6 : vector<8x32xf32>
    %28 = arith.mulf %23, %25 : vector<8x32xf32>
    %29 = arith.addf %27, %28 : vector<8x32xf32>
    %30 = math.tanh %29 : vector<8x32xf32>
    %31 = arith.mulf %26, %30 : vector<8x32xf32>
    %32 = arith.truncf %31 : vector<8x32xf32> to vector<8x32xbf16>
    %c1_i32 = arith.constant 1 : i32
    %33 = arith.index_cast %c1_i32 : i32 to index
    %c0_13 = arith.constant 0 : index
    %c0_14 = arith.constant 0 : index
    %34 = vector.load %arg2[%33, %c0_13, %c0_14] : memref<8x8x128xbf16, #tpu.memory_space<vmem>>, vector<1x8x128xbf16>
    %35 = vector.shape_cast %34 : vector<1x8x128xbf16> to vector<8x128xbf16>
    %36 = arith.extf %35 : vector<8x128xbf16> to vector<8x128xf32>
    %c0_15 = arith.constant 0 : index
    %c0_16 = arith.constant 0 : index
    %37 = vector.load %arg3[%c0_15, %c0_16] : memref<32x128xbf16, #tpu.memory_space<vmem>>, vector<32x128xbf16>
    %cst_17 = arith.constant dense<0.000000e+00> : vector<8x128xf32>
    %38 = tpu.matmul %32, %37, %cst_17 {dimension_numbers = #tpu.dot_dimension_numbers<[1], [0], [0], [1], [0, 0, 1, 1], [], []>} : vector<8x32xbf16>, vector<32x128xbf16>, vector<8x128xf32> -> vector<8x128xf32>
    %39 = arith.addf %36, %38 : vector<8x128xf32>
    %40 = arith.negf %39 : vector<8x128xf32>
    %41 = math.exp %40 : vector<8x128xf32>
    %cst_18 = arith.constant 1.000000e+00 : f32
    %42 = vector.broadcast %cst_18 : f32 to vector<8x128xf32>
    %43 = arith.addf %42, %41 : vector<8x128xf32>
    %44 = arith.divf %42, %43 : vector<8x128xf32>
    %45 = vector.broadcast %3 : vector<1x128xf32> to vector<8x128xf32>
    %46 = arith.mulf %44, %45 : vector<8x128xf32>
    %47 = vector.broadcast %4 : vector<1x128xf32> to vector<8x128xf32>
    %48 = arith.addf %46, %47 : vector<8x128xf32>
    %49 = vector.extract_strided_slice %48 {offsets = [0, 0], sizes = [8, 32], strides = [1, 1]} : vector<8x128xf32> to vector<8x32xf32>
    %50 = vector.extract_strided_slice %48 {offsets = [0, 32], sizes = [8, 32], strides = [1, 1]} : vector<8x128xf32> to vector<8x32xf32>
    %51 = vector.extract_strided_slice %48 {offsets = [0, 64], sizes = [8, 32], strides = [1, 1]} : vector<8x128xf32> to vector<8x32xf32>
    %52 = vector.extract_strided_slice %48 {offsets = [0, 96], sizes = [8, 32], strides = [1, 1]} : vector<8x128xf32> to vector<8x32xf32>
    %53 = arith.mulf %50, %29 : vector<8x32xf32>
    %54 = arith.mulf %49, %51 : vector<8x32xf32>
    %55 = arith.addf %53, %54 : vector<8x32xf32>
    %56 = math.tanh %55 : vector<8x32xf32>
    %57 = arith.mulf %52, %56 : vector<8x32xf32>
    %58 = arith.truncf %57 : vector<8x32xf32> to vector<8x32xbf16>
    %c2_i32 = arith.constant 2 : i32
    %59 = arith.index_cast %c2_i32 : i32 to index
    %c0_19 = arith.constant 0 : index
    %c0_20 = arith.constant 0 : index
    %60 = vector.load %arg2[%59, %c0_19, %c0_20] : memref<8x8x128xbf16, #tpu.memory_space<vmem>>, vector<1x8x128xbf16>
    %61 = vector.shape_cast %60 : vector<1x8x128xbf16> to vector<8x128xbf16>
    %62 = arith.extf %61 : vector<8x128xbf16> to vector<8x128xf32>
    %c0_21 = arith.constant 0 : index
    %c0_22 = arith.constant 0 : index
    %63 = vector.load %arg3[%c0_21, %c0_22] : memref<32x128xbf16, #tpu.memory_space<vmem>>, vector<32x128xbf16>
    %cst_23 = arith.constant dense<0.000000e+00> : vector<8x128xf32>
    %64 = tpu.matmul %58, %63, %cst_23 {dimension_numbers = #tpu.dot_dimension_numbers<[1], [0], [0], [1], [0, 0, 1, 1], [], []>} : vector<8x32xbf16>, vector<32x128xbf16>, vector<8x128xf32> -> vector<8x128xf32>
    %65 = arith.addf %62, %64 : vector<8x128xf32>
    %66 = arith.negf %65 : vector<8x128xf32>
    %67 = math.exp %66 : vector<8x128xf32>
    %cst_24 = arith.constant 1.000000e+00 : f32
    %68 = vector.broadcast %cst_24 : f32 to vector<8x128xf32>
    %69 = arith.addf %68, %67 : vector<8x128xf32>
    %70 = arith.divf %68, %69 : vector<8x128xf32>
    %71 = vector.broadcast %3 : vector<1x128xf32> to vector<8x128xf32>
    %72 = arith.mulf %70, %71 : vector<8x128xf32>
    %73 = vector.broadcast %4 : vector<1x128xf32> to vector<8x128xf32>
    %74 = arith.addf %72, %73 : vector<8x128xf32>
    %75 = vector.extract_strided_slice %74 {offsets = [0, 0], sizes = [8, 32], strides = [1, 1]} : vector<8x128xf32> to vector<8x32xf32>
    %76 = vector.extract_strided_slice %74 {offsets = [0, 32], sizes = [8, 32], strides = [1, 1]} : vector<8x128xf32> to vector<8x32xf32>
    %77 = vector.extract_strided_slice %74 {offsets = [0, 64], sizes = [8, 32], strides = [1, 1]} : vector<8x128xf32> to vector<8x32xf32>
    %78 = vector.extract_strided_slice %74 {offsets = [0, 96], sizes = [8, 32], strides = [1, 1]} : vector<8x128xf32> to vector<8x32xf32>
    %79 = arith.mulf %76, %55 : vector<8x32xf32>
    %80 = arith.mulf %75, %77 : vector<8x32xf32>
    %81 = arith.addf %79, %80 : vector<8x32xf32>
    %82 = math.tanh %81 : vector<8x32xf32>
    %83 = arith.mulf %78, %82 : vector<8x32xf32>
    %84 = arith.truncf %83 : vector<8x32xf32> to vector<8x32xbf16>
    %c3_i32 = arith.constant 3 : i32
    %85 = arith.index_cast %c3_i32 : i32 to index
    %c0_25 = arith.constant 0 : index
    %c0_26 = arith.constant 0 : index
    %86 = vector.load %arg2[%85, %c0_25, %c0_26] : memref<8x8x128xbf16, #tpu.memory_space<vmem>>, vector<1x8x128xbf16>
    %87 = vector.shape_cast %86 : vector<1x8x128xbf16> to vector<8x128xbf16>
    %88 = arith.extf %87 : vector<8x128xbf16> to vector<8x128xf32>
    %c0_27 = arith.constant 0 : index
    %c0_28 = arith.constant 0 : index
    %89 = vector.load %arg3[%c0_27, %c0_28] : memref<32x128xbf16, #tpu.memory_space<vmem>>, vector<32x128xbf16>
    %cst_29 = arith.constant dense<0.000000e+00> : vector<8x128xf32>
    %90 = tpu.matmul %84, %89, %cst_29 {dimension_numbers = #tpu.dot_dimension_numbers<[1], [0], [0], [1], [0, 0, 1, 1], [], []>} : vector<8x32xbf16>, vector<32x128xbf16>, vector<8x128xf32> -> vector<8x128xf32>
    %91 = arith.addf %88, %90 : vector<8x128xf32>
    %92 = arith.negf %91 : vector<8x128xf32>
    %93 = math.exp %92 : vector<8x128xf32>
    %cst_30 = arith.constant 1.000000e+00 : f32
    %94 = vector.broadcast %cst_30 : f32 to vector<8x128xf32>
    %95 = arith.addf %94, %93 : vector<8x128xf32>
    %96 = arith.divf %94, %95 : vector<8x128xf32>
    %97 = vector.broadcast %3 : vector<1x128xf32> to vector<8x128xf32>
    %98 = arith.mulf %96, %97 : vector<8x128xf32>
    %99 = vector.broadcast %4 : vector<1x128xf32> to vector<8x128xf32>
    %100 = arith.addf %98, %99 : vector<8x128xf32>
    %101 = vector.extract_strided_slice %100 {offsets = [0, 0], sizes = [8, 32], strides = [1, 1]} : vector<8x128xf32> to vector<8x32xf32>
    %102 = vector.extract_strided_slice %100 {offsets = [0, 32], sizes = [8, 32], strides = [1, 1]} : vector<8x128xf32> to vector<8x32xf32>
    %103 = vector.extract_strided_slice %100 {offsets = [0, 64], sizes = [8, 32], strides = [1, 1]} : vector<8x128xf32> to vector<8x32xf32>
    %104 = vector.extract_strided_slice %100 {offsets = [0, 96], sizes = [8, 32], strides = [1, 1]} : vector<8x128xf32> to vector<8x32xf32>
    %105 = arith.mulf %102, %81 : vector<8x32xf32>
    %106 = arith.mulf %101, %103 : vector<8x32xf32>
    %107 = arith.addf %105, %106 : vector<8x32xf32>
    %108 = math.tanh %107 : vector<8x32xf32>
    %109 = arith.mulf %104, %108 : vector<8x32xf32>
    %110 = arith.truncf %109 : vector<8x32xf32> to vector<8x32xbf16>
    %c4_i32 = arith.constant 4 : i32
    %111 = arith.index_cast %c4_i32 : i32 to index
    %c0_31 = arith.constant 0 : index
    %c0_32 = arith.constant 0 : index
    %112 = vector.load %arg2[%111, %c0_31, %c0_32] : memref<8x8x128xbf16, #tpu.memory_space<vmem>>, vector<1x8x128xbf16>
    %113 = vector.shape_cast %112 : vector<1x8x128xbf16> to vector<8x128xbf16>
    %114 = arith.extf %113 : vector<8x128xbf16> to vector<8x128xf32>
    %c0_33 = arith.constant 0 : index
    %c0_34 = arith.constant 0 : index
    %115 = vector.load %arg3[%c0_33, %c0_34] : memref<32x128xbf16, #tpu.memory_space<vmem>>, vector<32x128xbf16>
    %cst_35 = arith.constant dense<0.000000e+00> : vector<8x128xf32>
    %116 = tpu.matmul %110, %115, %cst_35 {dimension_numbers = #tpu.dot_dimension_numbers<[1], [0], [0], [1], [0, 0, 1, 1], [], []>} : vector<8x32xbf16>, vector<32x128xbf16>, vector<8x128xf32> -> vector<8x128xf32>
    %117 = arith.addf %114, %116 : vector<8x128xf32>
    %118 = arith.negf %117 : vector<8x128xf32>
    %119 = math.exp %118 : vector<8x128xf32>
    %cst_36 = arith.constant 1.000000e+00 : f32
    %120 = vector.broadcast %cst_36 : f32 to vector<8x128xf32>
    %121 = arith.addf %120, %119 : vector<8x128xf32>
    %122 = arith.divf %120, %121 : vector<8x128xf32>
    %123 = vector.broadcast %3 : vector<1x128xf32> to vector<8x128xf32>
    %124 = arith.mulf %122, %123 : vector<8x128xf32>
    %125 = vector.broadcast %4 : vector<1x128xf32> to vector<8x128xf32>
    %126 = arith.addf %124, %125 : vector<8x128xf32>
    %127 = vector.extract_strided_slice %126 {offsets = [0, 0], sizes = [8, 32], strides = [1, 1]} : vector<8x128xf32> to vector<8x32xf32>
    %128 = vector.extract_strided_slice %126 {offsets = [0, 32], sizes = [8, 32], strides = [1, 1]} : vector<8x128xf32> to vector<8x32xf32>
    %129 = vector.extract_strided_slice %126 {offsets = [0, 64], sizes = [8, 32], strides = [1, 1]} : vector<8x128xf32> to vector<8x32xf32>
    %130 = vector.extract_strided_slice %126 {offsets = [0, 96], sizes = [8, 32], strides = [1, 1]} : vector<8x128xf32> to vector<8x32xf32>
    %131 = arith.mulf %128, %107 : vector<8x32xf32>
    %132 = arith.mulf %127, %129 : vector<8x32xf32>
    %133 = arith.addf %131, %132 : vector<8x32xf32>
    %134 = math.tanh %133 : vector<8x32xf32>
    %135 = arith.mulf %130, %134 : vector<8x32xf32>
    %136 = arith.truncf %135 : vector<8x32xf32> to vector<8x32xbf16>
    %c5_i32 = arith.constant 5 : i32
    %137 = arith.index_cast %c5_i32 : i32 to index
    %c0_37 = arith.constant 0 : index
    %c0_38 = arith.constant 0 : index
    %138 = vector.load %arg2[%137, %c0_37, %c0_38] : memref<8x8x128xbf16, #tpu.memory_space<vmem>>, vector<1x8x128xbf16>
    %139 = vector.shape_cast %138 : vector<1x8x128xbf16> to vector<8x128xbf16>
    %140 = arith.extf %139 : vector<8x128xbf16> to vector<8x128xf32>
    %c0_39 = arith.constant 0 : index
    %c0_40 = arith.constant 0 : index
    %141 = vector.load %arg3[%c0_39, %c0_40] : memref<32x128xbf16, #tpu.memory_space<vmem>>, vector<32x128xbf16>
    %cst_41 = arith.constant dense<0.000000e+00> : vector<8x128xf32>
    %142 = tpu.matmul %136, %141, %cst_41 {dimension_numbers = #tpu.dot_dimension_numbers<[1], [0], [0], [1], [0, 0, 1, 1], [], []>} : vector<8x32xbf16>, vector<32x128xbf16>, vector<8x128xf32> -> vector<8x128xf32>
    %143 = arith.addf %140, %142 : vector<8x128xf32>
    %144 = arith.negf %143 : vector<8x128xf32>
    %145 = math.exp %144 : vector<8x128xf32>
    %cst_42 = arith.constant 1.000000e+00 : f32
    %146 = vector.broadcast %cst_42 : f32 to vector<8x128xf32>
    %147 = arith.addf %146, %145 : vector<8x128xf32>
    %148 = arith.divf %146, %147 : vector<8x128xf32>
    %149 = vector.broadcast %3 : vector<1x128xf32> to vector<8x128xf32>
    %150 = arith.mulf %148, %149 : vector<8x128xf32>
    %151 = vector.broadcast %4 : vector<1x128xf32> to vector<8x128xf32>
    %152 = arith.addf %150, %151 : vector<8x128xf32>
    %153 = vector.extract_strided_slice %152 {offsets = [0, 0], sizes = [8, 32], strides = [1, 1]} : vector<8x128xf32> to vector<8x32xf32>
    %154 = vector.extract_strided_slice %152 {offsets = [0, 32], sizes = [8, 32], strides = [1, 1]} : vector<8x128xf32> to vector<8x32xf32>
    %155 = vector.extract_strided_slice %152 {offsets = [0, 64], sizes = [8, 32], strides = [1, 1]} : vector<8x128xf32> to vector<8x32xf32>
    %156 = vector.extract_strided_slice %152 {offsets = [0, 96], sizes = [8, 32], strides = [1, 1]} : vector<8x128xf32> to vector<8x32xf32>
    %157 = arith.mulf %154, %133 : vector<8x32xf32>
    %158 = arith.mulf %153, %155 : vector<8x32xf32>
    %159 = arith.addf %157, %158 : vector<8x32xf32>
    %160 = math.tanh %159 : vector<8x32xf32>
    %161 = arith.mulf %156, %160 : vector<8x32xf32>
    %162 = arith.truncf %161 : vector<8x32xf32> to vector<8x32xbf16>
    %c6_i32 = arith.constant 6 : i32
    %163 = arith.index_cast %c6_i32 : i32 to index
    %c0_43 = arith.constant 0 : index
    %c0_44 = arith.constant 0 : index
    %164 = vector.load %arg2[%163, %c0_43, %c0_44] : memref<8x8x128xbf16, #tpu.memory_space<vmem>>, vector<1x8x128xbf16>
    %165 = vector.shape_cast %164 : vector<1x8x128xbf16> to vector<8x128xbf16>
    %166 = arith.extf %165 : vector<8x128xbf16> to vector<8x128xf32>
    %c0_45 = arith.constant 0 : index
    %c0_46 = arith.constant 0 : index
    %167 = vector.load %arg3[%c0_45, %c0_46] : memref<32x128xbf16, #tpu.memory_space<vmem>>, vector<32x128xbf16>
    %cst_47 = arith.constant dense<0.000000e+00> : vector<8x128xf32>
    %168 = tpu.matmul %162, %167, %cst_47 {dimension_numbers = #tpu.dot_dimension_numbers<[1], [0], [0], [1], [0, 0, 1, 1], [], []>} : vector<8x32xbf16>, vector<32x128xbf16>, vector<8x128xf32> -> vector<8x128xf32>
    %169 = arith.addf %166, %168 : vector<8x128xf32>
    %170 = arith.negf %169 : vector<8x128xf32>
    %171 = math.exp %170 : vector<8x128xf32>
    %cst_48 = arith.constant 1.000000e+00 : f32
    %172 = vector.broadcast %cst_48 : f32 to vector<8x128xf32>
    %173 = arith.addf %172, %171 : vector<8x128xf32>
    %174 = arith.divf %172, %173 : vector<8x128xf32>
    %175 = vector.broadcast %3 : vector<1x128xf32> to vector<8x128xf32>
    %176 = arith.mulf %174, %175 : vector<8x128xf32>
    %177 = vector.broadcast %4 : vector<1x128xf32> to vector<8x128xf32>
    %178 = arith.addf %176, %177 : vector<8x128xf32>
    %179 = vector.extract_strided_slice %178 {offsets = [0, 0], sizes = [8, 32], strides = [1, 1]} : vector<8x128xf32> to vector<8x32xf32>
    %180 = vector.extract_strided_slice %178 {offsets = [0, 32], sizes = [8, 32], strides = [1, 1]} : vector<8x128xf32> to vector<8x32xf32>
    %181 = vector.extract_strided_slice %178 {offsets = [0, 64], sizes = [8, 32], strides = [1, 1]} : vector<8x128xf32> to vector<8x32xf32>
    %182 = vector.extract_strided_slice %178 {offsets = [0, 96], sizes = [8, 32], strides = [1, 1]} : vector<8x128xf32> to vector<8x32xf32>
    %183 = arith.mulf %180, %159 : vector<8x32xf32>
    %184 = arith.mulf %179, %181 : vector<8x32xf32>
    %185 = arith.addf %183, %184 : vector<8x32xf32>
    %186 = math.tanh %185 : vector<8x32xf32>
    %187 = arith.mulf %182, %186 : vector<8x32xf32>
    %188 = arith.truncf %187 : vector<8x32xf32> to vector<8x32xbf16>
    %c7_i32 = arith.constant 7 : i32
    %189 = arith.index_cast %c7_i32 : i32 to index
    %c0_49 = arith.constant 0 : index
    %c0_50 = arith.constant 0 : index
    %190 = vector.load %arg2[%189, %c0_49, %c0_50] : memref<8x8x128xbf16, #tpu.memory_space<vmem>>, vector<1x8x128xbf16>
    %191 = vector.shape_cast %190 : vector<1x8x128xbf16> to vector<8x128xbf16>
    %192 = arith.extf %191 : vector<8x128xbf16> to vector<8x128xf32>
    %c0_51 = arith.constant 0 : index
    %c0_52 = arith.constant 0 : index
    %193 = vector.load %arg3[%c0_51, %c0_52] : memref<32x128xbf16, #tpu.memory_space<vmem>>, vector<32x128xbf16>
    %cst_53 = arith.constant dense<0.000000e+00> : vector<8x128xf32>
    %194 = tpu.matmul %188, %193, %cst_53 {dimension_numbers = #tpu.dot_dimension_numbers<[1], [0], [0], [1], [0, 0, 1, 1], [], []>} : vector<8x32xbf16>, vector<32x128xbf16>, vector<8x128xf32> -> vector<8x128xf32>
    %195 = arith.addf %192, %194 : vector<8x128xf32>
    %196 = arith.negf %195 : vector<8x128xf32>
    %197 = math.exp %196 : vector<8x128xf32>
    %cst_54 = arith.constant 1.000000e+00 : f32
    %198 = vector.broadcast %cst_54 : f32 to vector<8x128xf32>
    %199 = arith.addf %198, %197 : vector<8x128xf32>
    %200 = arith.divf %198, %199 : vector<8x128xf32>
    %201 = vector.broadcast %3 : vector<1x128xf32> to vector<8x128xf32>
    %202 = arith.mulf %200, %201 : vector<8x128xf32>
    %203 = vector.broadcast %4 : vector<1x128xf32> to vector<8x128xf32>
    %204 = arith.addf %202, %203 : vector<8x128xf32>
    %205 = vector.extract_strided_slice %204 {offsets = [0, 0], sizes = [8, 32], strides = [1, 1]} : vector<8x128xf32> to vector<8x32xf32>
    %206 = vector.extract_strided_slice %204 {offsets = [0, 32], sizes = [8, 32], strides = [1, 1]} : vector<8x128xf32> to vector<8x32xf32>
    %207 = vector.extract_strided_slice %204 {offsets = [0, 64], sizes = [8, 32], strides = [1, 1]} : vector<8x128xf32> to vector<8x32xf32>
    %208 = vector.extract_strided_slice %204 {offsets = [0, 96], sizes = [8, 32], strides = [1, 1]} : vector<8x128xf32> to vector<8x32xf32>
    %209 = arith.mulf %206, %185 : vector<8x32xf32>
    %210 = arith.mulf %205, %207 : vector<8x32xf32>
    %211 = arith.addf %209, %210 : vector<8x32xf32>
    %212 = math.tanh %211 : vector<8x32xf32>
    %213 = arith.mulf %208, %212 : vector<8x32xf32>
    %214 = arith.truncf %213 : vector<8x32xf32> to vector<8x32xbf16>
    %c8_i32 = arith.constant 8 : i32
    %c0_55 = arith.constant 0 : index
    %c0_56 = arith.constant 0 : index
    %215 = vector.load %arg8[%c0_55, %c0_56] : memref<8x32xbf16, #tpu.memory_space<vmem>>, vector<8x32xbf16>
    tpu.vector_store %arg8[%c0_55, %c0_56], %214 {strides = array<i32>} : memref<8x32xbf16, #tpu.memory_space<vmem>>, vector<8x32xbf16>,
    %c0_57 = arith.constant 0 : index
    %c0_58 = arith.constant 0 : index
    %216 = vector.load %arg9[%c0_57, %c0_58] : memref<8x32xf32, #tpu.memory_space<vmem>>, vector<8x32xf32>
    tpu.vector_store %arg9[%c0_57, %c0_58], %211 {strides = array<i32>} : memref<8x32xf32, #tpu.memory_space<vmem>>, vector<8x32xf32>,
    %c0_i32_59 = arith.constant 0 : i32
    %217 = arith.cmpi eq, %arg1, %c0_i32_59 : i32
    %218 = arith.extui %217 : i1 to i32
    %c0_i32_60 = arith.constant 0 : i32
    %219 = arith.cmpi ne, %218, %c0_i32_60 : i32
    scf.if %219 {
      %c0_61 = arith.constant 0 : index
      %c0_62 = arith.constant 0 : index
      %220 = vector.load %arg5[%c0_61, %c0_62] : memref<32x128xbf16, #tpu.memory_space<vmem>>, vector<32x128xbf16>
      %cst_63 = arith.constant dense<0.000000e+00> : vector<8x128xf32>
      %221 = tpu.matmul %214, %220, %cst_63 {dimension_numbers = #tpu.dot_dimension_numbers<[1], [0], [0], [1], [0, 0, 1, 1], [], []>} : vector<8x32xbf16>, vector<32x128xbf16>, vector<8x128xf32> -> vector<8x128xf32>
      %c0_64 = arith.constant 0 : index
      %c0_65 = arith.constant 0 : index
      %222 = vector.load %arg6[%c0_64, %c0_65] : memref<1x128xf32, #tpu.memory_space<vmem>>, vector<1x128xf32>
      %223 = vector.broadcast %222 : vector<1x128xf32> to vector<8x128xf32>
      %224 = arith.addf %221, %223 : vector<8x128xf32>
      %c0_66 = arith.constant 0 : index
      %c0_67 = arith.constant 0 : index
      %225 = vector.load %arg7[%c0_66, %c0_67] : memref<8x128xf32, #tpu.memory_space<vmem>>, vector<8x128xf32>
      tpu.vector_store %arg7[%c0_66, %c0_67], %224 {strides = array<i32>} : memref<8x128xf32, #tpu.memory_space<vmem>>, vector<8x128xf32>,
    } else {
    }
    return
  }
  func.func @transform_0(%arg0: i32, %arg1: i32) -> (i32, i32, i32) {
    %c0_i32 = arith.constant 0 : i32
    %c0_i32_0 = arith.constant 0 : i32
    return %arg1, %arg0, %c0_i32 : i32, i32, i32
  }
  func.func @transform_1(%arg0: i32, %arg1: i32) -> (i32, i32) {
    %c0_i32 = arith.constant 0 : i32
    %c0_i32_0 = arith.constant 0 : i32
    %c0_i32_1 = arith.constant 0 : i32
    return %c0_i32, %c0_i32_0 : i32, i32
  }
  func.func @transform_2(%arg0: i32, %arg1: i32) -> (i32, i32) {
    %c0_i32 = arith.constant 0 : i32
    %c0_i32_0 = arith.constant 0 : i32
    %c0_i32_1 = arith.constant 0 : i32
    return %c0_i32, %c0_i32_0 : i32, i32
  }
  func.func @transform_3(%arg0: i32, %arg1: i32) -> (i32, i32) {
    %c0_i32 = arith.constant 0 : i32
    %c0_i32_0 = arith.constant 0 : i32
    %c0_i32_1 = arith.constant 0 : i32
    return %c0_i32, %c0_i32_0 : i32, i32
  }
  func.func @transform_4(%arg0: i32, %arg1: i32) -> (i32, i32) {
    %c0_i32 = arith.constant 0 : i32
    %c0_i32_0 = arith.constant 0 : i32
    %c0_i32_1 = arith.constant 0 : i32
    return %c0_i32, %c0_i32_0 : i32, i32
  }
  func.func @transform_5(%arg0: i32, %arg1: i32) -> (i32, i32) {
    %c0_i32 = arith.constant 0 : i32
    %c0_i32_0 = arith.constant 0 : i32
    return %arg0, %c0_i32 : i32, i32
  }
}

</mosaic_0001>

<bundles_post_ra>
// kernel: tpu_custom_call.1
= control target key start
LH: loop header
LB: loop body
LE: loop exit
PB: predicated region body
PF: predicated region fallthrough
CT: control target
= control target key end

     0   :  { %10 = vsyncpa [#allocation5], 0  ;;  %s1329_s0 = inlined_call_operand.hbm [shape: bf16[8,8,128], index: 0, kind: input, shape index: {}]   ;;  %s1330_s1 = inlined_call_operand.hbm [shape: bf16[32,128], index: 1, kind: input, shape index: {}]   ;;  %s1331_s2 = inlined_call_operand.vmem [shape: f32[2,128], index: 2, kind: input, shape index: {}]   ;;  %s1332_s3 = inlined_call_operand.hbm [shape: bf16[32,128], index: 3, kind: input, shape index: {}]   ;;  %s1333_s4 = inlined_call_operand.vmem [shape: f32[1,128], index: 4, kind: input, shape index: {}]   ;;  %s1334_s5 = inlined_call_operand.hbm [shape: f32[8,128], index: 5, kind: output, shape index: {}]  }
   0x1   :  { %11 = vsyncpa [#allocation8], 0 }
   0x2   :  { %12 = vsyncpa [#allocation6], 0  ;;  %s1091_s18 = smov [#allocation7]   ;;  %s1092_s20 = smov [#allocation4]  }
   0x3   :  { %s30_s19 = sshll.u32 %s1091_s18, 4  ;;  %s18_s21 = sshll.u32 %s1092_s20, 4  ;;  %s31_s19 = int_to_ptr.vmem [resolvable:$true] %s30_s19  ;;  %s1132_s21 = int_to_ptr.vmem [resolvable:$true] %s18_s21 }
   0x4   :  { %s997_s24 = scalar_lea.hbm %s1330_s1, 256 }
   0x5   :  { %p998_p0 = scmp.ne.s32.totalorder %s1330_s1, %s997_s24  ;;  %p1001_p1 = scmp.lt.u32.totalorder %s997_s24, %s1330_s1 }
   0x7   :  { %p1003_p2 = pnand %p1001_p1, %p998_p0 }
   0x9   :  { %1006 = shalt.err (!%p1003_p2)
}
   0xa   :  { %s1007_s29 = scalar_lea.vmem %s31_s19, 256  ;;  %p1012_p4 = scmp.lt.s32.totalorder %s31_s19, %s31_s19 }
   0xb   :  { %p1008_p3 = scmp.ne.s32.totalorder %s31_s19, %s1007_s29  ;;  %p1013_p5 = scmp.lt.s32.totalorder %s1007_s29, %s1007_s29 }
   0xd   :  { %p1014_p6 = por %p1013_p5, %p1012_p4 }
   0xf   :  { %p1015_p7 = pnand %p1014_p6, %p1008_p3 }
  0x11   :  { %1018 = shalt.err (!%p1015_p7)
}
  0x12   :  { %s1093_s30 = smov 64   ;;  %s1094_s6 = smov 4  }
  0x13   :  { %36 = dma.hbm_to_vmem [thread:$0]  %s1330_s1, 256, %s31_s19, [#allocation8], %s1093_s30, %s1093_s30, %s1094_s6  }
  0x14   :  { %s1019_s11 = scalar_lea.hbm %s1329_s0, 512 }
  0x15   :  { %p1020_p8 = scmp.ne.s32.totalorder %s1329_s0, %s1019_s11  ;;  %p1023_p9 = scmp.lt.u32.totalorder %s1019_s11, %s1329_s0 }
  0x17   :  { %p1025_p10 = pnand %p1023_p9, %p1020_p8 }
  0x19   :  { %1028 = shalt.err (!%p1025_p10)
}
  0x1a   :  { %s1029_s16 = scalar_lea.vmem %s1132_s21, 512  ;;  %p1034_p12 = scmp.lt.s32.totalorder %s1132_s21, %s1132_s21 }
  0x1b   :  { %p1030_p11 = scmp.ne.s32.totalorder %s1132_s21, %s1029_s16  ;;  %p1035_p13 = scmp.lt.s32.totalorder %s1029_s16, %s1029_s16 }
  0x1d   :  { %p1036_p0 = por %p1035_p13, %p1034_p12 }
  0x1f   :  { %p1037_p1 = pnand %p1036_p0, %p1030_p11 }
  0x21   :  { %1040 = shalt.err (!%p1037_p1)
}
  0x22   :  { %24 = dma.hbm_to_vmem [thread:$0]  %s1329_s0, 512, %s1132_s21, [#allocation5], %s1093_s30, %s1093_s30, %s1094_s6  }
  0x23   :  { %s1095_s18 = smov [#allocation9]   ;;  %s1041_s23 = scalar_lea.hbm %s1332_s3, 256 }
  0x24   :  { %s44_s19 = sshll.u32 %s1095_s18, 4  ;;  %p1042_p2 = scmp.ne.s32.totalorder %s1332_s3, %s1041_s23  ;;  %s45_s19 = int_to_ptr.vmem [resolvable:$true] %s44_s19 }
  0x25   :  { %p1045_p3 = scmp.lt.u32.totalorder %s1041_s23, %s1332_s3 }
  0x27   :  { %p1047_p4 = pnand %p1045_p3, %p1042_p2 }
  0x29   :  { %1050 = shalt.err (!%p1047_p4)
}
  0x2a   :  { %s1051_s28 = scalar_lea.vmem %s45_s19, 256  ;;  %p1056_p6 = scmp.lt.s32.totalorder %s45_s19, %s45_s19 }
  0x2b   :  { %p1052_p5 = scmp.ne.s32.totalorder %s45_s19, %s1051_s28  ;;  %p1057_p7 = scmp.lt.s32.totalorder %s1051_s28, %s1051_s28 }
  0x2d   :  { %p1058_p8 = por %p1057_p7, %p1056_p6 }
  0x2f   :  { %p1059_p9 = pnand %p1058_p8, %p1052_p5 }
  0x31   :  { %1062 = shalt.err (!%p1059_p9)
}
  0x32   :  { %50 = dma.hbm_to_vmem [thread:$0]  %s1332_s3, 256, %s45_s19, [#allocation8], %s1093_s30, %s1093_s30, %s1094_s6  }
  0x33   :  { %1085 = dma.done.wait [#allocation5], 512  }
  0x34   :  { %1086 = vsyncadd [#allocation5], 4294966784 }
  0x35   :  { %1087 = dma.done.wait [#allocation8], 512  }
  0x36   :  { %1088 = vsyncadd [#allocation8], 4294966784  ;;  %vm67_vm0 = vcmask 257024   ;;  %v1096_v0 = vmov 0.0   ;;  %vm1097_vm1 = vmmov 0   ;;  %v1098_v1 = vmov 0  }
  0x37   :  { %862 = vmatprep.subr.bf16.mxu0 %v1096_v0  ;;  %866 = vmatprep.mubr.msk.bf16.mxu0 %vm1097_vm1, %v1096_v0  ;;  %68 = vst.msk [vmem:[#allocation2] sm:$0xf] %vm67_vm0, %v1098_v1  ;;  %vm69_vm2 = vcmask 261120   ;;  %v1193_v2 = vld [vmem:[#allocation7] sm:$0xff]   ;;  %v1196_v3 = vld [vmem:[#allocation7 + $0x8] sm:$0xff]   ;;  %s1099_s8 = smov 32  }
  0x38   :  { %70 = vst.msk [vmem:[#allocation3] sm:$0xff] %vm69_vm2, %v1096_v0  ;;  %870 = vmatprep.subr.bf16.mxu1 %v1096_v0  ;;  %874 = vmatprep.mubr.msk.bf16.mxu1 %vm1097_vm1, %v1096_v0  ;;  %v75_v5 = vld [vmem:[#allocation4] sm:$0xff]   ;;  %v1215_v15 = vld [vmem:[%s1331_s2] ss:$0 sm:$0xff]  ;;  %v1220_v17 = vld [vmem:[%s1331_s2 + $0x1] ss:$0 sm:$0xff] }
  0x39   :  { %863 = vmatpush3.bf16.msra.mxu0 %v1193_v2  ;;  %871 = vmatpush3.bf16.msra.mxu1 %v1193_v2  ;;  %v76_v6 = vunpack.c.l.bf16 %v75_v5  ;;  %v178_v32 = vunpack.c.h.bf16 %v75_v5  ;;  %v253_v54 = vld [vmem:[#allocation4 + $0x8] sm:$0xff]   ;;  %s1100_s2 = smov 96   ;;  %s1101_s10 = smov [#allocation10]  }
  0x3a   :  { %864 = vmatprep.subr.bf16.mxu0 %v1096_v0  ;;  %872 = vmatprep.subr.bf16.mxu1 %v1096_v0  ;;  %v254_v55 = vunpack.c.l.bf16 %v253_v54  ;;  %s799_s11 = sshll.u32 %s1101_s10, 4  ;;  %s800_s11 = int_to_ptr.vmem [resolvable:$true] %s799_s11 }
  0x3b   :  { %s1063_s12 = scalar_lea.vmem %s800_s11, 128  ;;  %p1068_p11 = scmp.lt.s32.totalorder %s800_s11, %s800_s11 }
  0x3c   :  { %p1064_p10 = scmp.ne.s32.totalorder %s800_s11, %s1063_s12  ;;  %p1069_p12 = scmp.lt.s32.totalorder %s1063_s12, %s1063_s12 }
  0x3d   :  { %865 = vmatpush3.bf16.msra.mxu0 %v1196_v3  ;;  %873 = vmatpush3.bf16.msra.mxu1 %v1196_v3 }
  0x3e   :  { %v73_v4 = vld [vmem:[#allocation2] sm:$0xf]  ;;  %878 = vmatprep.subr.bf16.mxu0 %v1096_v0  ;;  %886 = vmatprep.subr.bf16.mxu1 %v1096_v0  ;;  %p1070_p13 = por %p1069_p12, %p1068_p11 }
  0x3f   :  { %v74_v20 = vld [vmem:[#allocation3] sm:$0xff] }
  0x40   :  { %867 = vmatmul.mubr.msk.bf16.vlgmr.msra.gmra.mrb[0].mxu0 %vm69_vm2, %v73_v4  ;;  %p1071_p0 = pnand %p1070_p13, %p1064_p10 }
  0x41   :  { %879 = vmatpush3.bf16.msra.mxu0 %v1193_v2  ;;  %882 = vmatprep.mubr.msk.bf16.mxu0 %vm1097_vm1, %v1096_v0 }
  0x42   :  { %880 = vmatprep.subr.bf16.mxu0 %v1096_v0 }
  0x45   :  { %881 = vmatpush3.bf16.msra.mxu0 %v1196_v3 }
  0x46   :  { %894 = vmatprep.subr.bf16.mxu0 %v1096_v0 }
 0x113   :  { %v131_v7 = vpop.f32.mrb[0].mxu0 }
 0x114   :  { %v137_v8 = vadd.f32 %v131_v7, %v76_v6  ;;  %v868_v9 = vpop.f32.mrb[1].mxu0 }
 0x115   :  { %v134_v10 = vpop.f32.mrb[2].mxu0 }
 0x116   :  { %v812_v11 = vmul.f32 -1.442695, %v137_v8  ;;  %v869_v12 = vpop.f32.mrb[3].mxu0 }
 0x118   :  { %949 = vpow2.f32 %v812_v11 }
 0x122   :  { %v950_v13 = vpop.eup %949 }
 0x123   :  { %v141_v14 = vadd.f32 1.0, %v950_v13 }
 0x125   :  { %951 = vrcp.f32 %v141_v14 }
 0x12f   :  { %v952_v16 = vpop.eup %951 }
 0x130   :  { %v148_v18 = vmul.f32 %v952_v16, %v1215_v15 }
 0x132   :  { %v153_v19 = vadd.f32 %v1220_v17, %v148_v18  ;;  %v330_v18 = vunpack.c.h.bf16 %v253_v54 }
 0x134   :  { %160 = vrot.lane.b32.xlu0 %v153_v19, %s1093_s30 }
 0x138   :  { %155 = vrot.lane.b32.xlu0 %v74_v20, %s1099_s8 }
 0x1a6   :  { %v161_v21 = vpop.permute.xlu0 %160 }
 0x1a7   :  { %v163_v22 = vmul.f32 %v161_v21, %v153_v19 }
 0x1a9   :  { %165 = vrot.lane.b32.xlu1 %v163_v22, %s1099_s8 }
 0x1aa   :  { %v156_v23 = vpop.permute.xlu0 %155 }
 0x1ab   :  { %v158_v24 = vmul.f32 %v156_v23, %v153_v19 }
 0x21b   :  { %v166_v25 = vpop.permute.xlu1 %165 }
 0x21c   :  { %v168_v26 = vadd.f32 %v166_v25, %v158_v24 }
 0x21e   :  { %953 = vtanh.f32 %v168_v26 }
 0x228   :  { %v954_v27 = vpop.eup %953 }
 0x229   :  { %171 = vrot.lane.b32.xlu1 %v954_v27, %s1093_s30 }
 0x29b   :  { %v172_v28 = vpop.permute.xlu1 %171 }
 0x29c   :  { %v174_v29 = vmul.f32 %v172_v28, %v153_v19 }
 0x29e   :  { %v175_v30 = vpack.c.bf16 %v174_v29, %v174_v29 }
 0x2a0   :  { %180 = vrot.lane.b32.xlu0 %v175_v30, %s1099_s8 }
 0x312   :  { %v181_v31 = vpop.permute.xlu0 %180 }
 0x313   :  { %875 = vmatmul.mubr.msk.bf16.vlgmr.msra.gmra.mrb[0].mxu1 %vm69_vm2, %v181_v31 }
 0x314   :  { %887 = vmatpush3.bf16.msra.mxu1 %v1193_v2  ;;  %890 = vmatprep.mubr.msk.bf16.mxu1 %vm1097_vm1, %v1096_v0 }
 0x315   :  { %888 = vmatprep.subr.bf16.mxu1 %v1096_v0 }
 0x318   :  { %889 = vmatpush3.bf16.msra.mxu1 %v1196_v3 }
 0x319   :  { %902 = vmatprep.subr.bf16.mxu1 %v1096_v0 }
 0x3e6   :  { %v219_v33 = vpop.f32.mrb[0].mxu1 }
 0x3e7   :  { %v225_v34 = vadd.f32 %v219_v33, %v178_v32  ;;  %v876_v35 = vpop.f32.mrb[1].mxu1 }
 0x3e8   :  { %v222_v36 = vpop.f32.mrb[2].mxu1 }
 0x3e9   :  { %v816_v37 = vmul.f32 -1.442695, %v225_v34  ;;  %v877_v38 = vpop.f32.mrb[3].mxu1 }
 0x3eb   :  { %955 = vpow2.f32 %v816_v37 }
 0x3f5   :  { %v956_v39 = vpop.eup %955 }
 0x3f6   :  { %v229_v40 = vadd.f32 1.0, %v956_v39 }
 0x3f8   :  { %957 = vrcp.f32 %v229_v40  ;;  %v405_v40 = vld [vmem:[#allocation4 + $0x10] sm:$0xff]  }
 0x402   :  { %v958_v41 = vpop.eup %957 }
 0x403   :  { %v232_v42 = vmul.f32 %v958_v41, %v1215_v15  ;;  %v406_v41 = vunpack.c.l.bf16 %v405_v40 }
 0x405   :  { %v233_v43 = vadd.f32 %v1220_v17, %v232_v42 }
 0x407   :  { %236 = vrot.lane.b32.xlu1 %v233_v43, %s1093_s30  ;;  %v234_v46 = vmul.f32 %v233_v43, %v168_v26 }
 0x479   :  { %v237_v44 = vpop.permute.xlu1 %236 }
 0x47a   :  { %v239_v45 = vmul.f32 %v237_v44, %v233_v43 }
 0x47c   :  { %241 = vrot.lane.b32.xlu0 %v239_v45, %s1099_s8 }
 0x4ee   :  { %v242_v47 = vpop.permute.xlu0 %241 }
 0x4ef   :  { %v244_v48 = vadd.f32 %v242_v47, %v234_v46 }
 0x4f1   :  { %959 = vtanh.f32 %v244_v48 }
 0x4fb   :  { %v960_v49 = vpop.eup %959 }
 0x4fc   :  { %247 = vrot.lane.b32.xlu1 %v960_v49, %s1093_s30 }
 0x56e   :  { %v248_v50 = vpop.permute.xlu1 %247 }
 0x56f   :  { %v250_v51 = vmul.f32 %v248_v50, %v233_v43 }
 0x571   :  { %v251_v52 = vpack.c.bf16 %v250_v51, %v250_v51 }
 0x573   :  { %256 = vrot.lane.b32.xlu0 %v251_v52, %s1099_s8 }
 0x5e5   :  { %v257_v53 = vpop.permute.xlu0 %256 }
 0x5e6   :  { %883 = vmatmul.mubr.msk.bf16.vlgmr.msra.gmra.mrb[4].mxu0 %vm69_vm2, %v257_v53 }
 0x5e7   :  { %895 = vmatpush3.bf16.msra.mxu0 %v1193_v2  ;;  %898 = vmatprep.mubr.msk.bf16.mxu0 %vm1097_vm1, %v1096_v0 }
 0x5e8   :  { %896 = vmatprep.subr.bf16.mxu0 %v1096_v0 }
 0x5eb   :  { %897 = vmatpush3.bf16.msra.mxu0 %v1196_v3 }
 0x5ec   :  { %910 = vmatprep.subr.bf16.mxu0 %v1096_v0 }
 0x6b9   :  { %v295_v56 = vpop.f32.mrb[4].mxu0 }
 0x6ba   :  { %v301_v57 = vadd.f32 %v295_v56, %v254_v55  ;;  %v884_v58 = vpop.f32.mrb[5].mxu0 }
 0x6bb   :  { %v298_v59 = vpop.f32.mrb[6].mxu0 }
 0x6bc   :  { %v818_v60 = vmul.f32 -1.442695, %v301_v57  ;;  %v885_v61 = vpop.f32.mrb[7].mxu0 }
 0x6be   :  { %961 = vpow2.f32 %v818_v60 }
 0x6c8   :  { %v962_v62 = vpop.eup %961 }
 0x6c9   :  { %v305_v63 = vadd.f32 1.0, %v962_v62 }
 0x6cb   :  { %963 = vrcp.f32 %v305_v63  ;;  %v482_v63 = vunpack.c.h.bf16 %v405_v40 }
 0x6d5   :  { %v964_v1 = vpop.eup %963 }
 0x6d6   :  { %v308_v4 = vmul.f32 %v964_v1, %v1215_v15 }
 0x6d8   :  { %v309_v5 = vadd.f32 %v1220_v17, %v308_v4 }
 0x6da   :  { %312 = vrot.lane.b32.xlu1 %v309_v5, %s1093_s30  ;;  %v310_v8 = vmul.f32 %v309_v5, %v244_v48 }
 0x74c   :  { %v313_v6 = vpop.permute.xlu1 %312 }
 0x74d   :  { %v315_v7 = vmul.f32 %v313_v6, %v309_v5 }
 0x74f   :  { %317 = vrot.lane.b32.xlu0 %v315_v7, %s1099_s8 }
 0x7c1   :  { %v318_v9 = vpop.permute.xlu0 %317 }
 0x7c2   :  { %v320_v10 = vadd.f32 %v318_v9, %v310_v8 }
 0x7c4   :  { %965 = vtanh.f32 %v320_v10 }
 0x7ce   :  { %v966_v11 = vpop.eup %965 }
 0x7cf   :  { %323 = vrot.lane.b32.xlu1 %v966_v11, %s1093_s30 }
 0x841   :  { %v324_v12 = vpop.permute.xlu1 %323 }
 0x842   :  { %v326_v13 = vmul.f32 %v324_v12, %v309_v5 }
 0x844   :  { %v327_v14 = vpack.c.bf16 %v326_v13, %v326_v13 }
 0x846   :  { %332 = vrot.lane.b32.xlu0 %v327_v14, %s1099_s8 }
 0x8b8   :  { %v333_v16 = vpop.permute.xlu0 %332 }
 0x8b9   :  { %891 = vmatmul.mubr.msk.bf16.vlgmr.msra.gmra.mrb[4].mxu1 %vm69_vm2, %v333_v16 }
 0x8ba   :  { %903 = vmatpush3.bf16.msra.mxu1 %v1193_v2  ;;  %906 = vmatprep.mubr.msk.bf16.mxu1 %vm1097_vm1, %v1096_v0 }
 0x8bb   :  { %904 = vmatprep.subr.bf16.mxu1 %v1096_v0 }
 0x8be   :  { %905 = vmatpush3.bf16.msra.mxu1 %v1196_v3 }
 0x8bf   :  { %918 = vmatprep.subr.bf16.mxu1 %v1096_v0 }
 0x98c   :  { %v371_v19 = vpop.f32.mrb[4].mxu1 }
 0x98d   :  { %v377_v20 = vadd.f32 %v371_v19, %v330_v18  ;;  %v892_v21 = vpop.f32.mrb[5].mxu1 }
 0x98e   :  { %v374_v22 = vpop.f32.mrb[6].mxu1 }
 0x98f   :  { %v820_v23 = vmul.f32 -1.442695, %v377_v20  ;;  %v893_v24 = vpop.f32.mrb[7].mxu1 }
 0x990   :  { %v557_v24 = vld [vmem:[#allocation4 + $0x18] sm:$0xff]  }
 0x991   :  { %967 = vpow2.f32 %v820_v23 }
 0x99b   :  { %v968_v25 = vpop.eup %967 }
 0x99c   :  { %v381_v26 = vadd.f32 1.0, %v968_v25  ;;  %v558_v25 = vunpack.c.l.bf16 %v557_v24 }
 0x99e   :  { %969 = vrcp.f32 %v381_v26 }
 0x9a8   :  { %v970_v27 = vpop.eup %969 }
 0x9a9   :  { %v384_v28 = vmul.f32 %v970_v27, %v1215_v15 }
 0x9ab   :  { %v385_v29 = vadd.f32 %v1220_v17, %v384_v28 }
 0x9ad   :  { %388 = vrot.lane.b32.xlu1 %v385_v29, %s1093_s30  ;;  %v386_v32 = vmul.f32 %v385_v29, %v320_v10 }
 0xa1f   :  { %v389_v30 = vpop.permute.xlu1 %388 }
 0xa20   :  { %v391_v31 = vmul.f32 %v389_v30, %v385_v29 }
 0xa22   :  { %393 = vrot.lane.b32.xlu0 %v391_v31, %s1099_s8 }
 0xa94   :  { %v394_v33 = vpop.permute.xlu0 %393 }
 0xa95   :  { %v396_v34 = vadd.f32 %v394_v33, %v386_v32 }
 0xa97   :  { %971 = vtanh.f32 %v396_v34 }
 0xaa1   :  { %v972_v35 = vpop.eup %971 }
 0xaa2   :  { %399 = vrot.lane.b32.xlu1 %v972_v35, %s1093_s30 }
 0xb14   :  { %v400_v36 = vpop.permute.xlu1 %399 }
 0xb15   :  { %v402_v37 = vmul.f32 %v400_v36, %v385_v29 }
 0xb17   :  { %v403_v38 = vpack.c.bf16 %v402_v37, %v402_v37 }
 0xb19   :  { %408 = vrot.lane.b32.xlu0 %v403_v38, %s1099_s8 }
 0xb8b   :  { %v409_v39 = vpop.permute.xlu0 %408 }
 0xb8c   :  { %899 = vmatmul.mubr.msk.bf16.vlgmr.msra.gmra.mrb[8].mxu0 %vm69_vm2, %v409_v39 }
 0xb8d   :  { %911 = vmatpush3.bf16.msra.mxu0 %v1193_v2  ;;  %914 = vmatprep.mubr.msk.bf16.mxu0 %vm1097_vm1, %v1096_v0 }
 0xb8e   :  { %912 = vmatprep.subr.bf16.mxu0 %v1096_v0 }
 0xb91   :  { %913 = vmatpush3.bf16.msra.mxu0 %v1196_v3 }
 0xb92   :  { %926 = vmatprep.subr.bf16.mxu0 %v1096_v0 }
 0xc5f   :  { %v447_v42 = vpop.f32.mrb[8].mxu0 }
 0xc60   :  { %v453_v43 = vadd.f32 %v447_v42, %v406_v41  ;;  %v900_v44 = vpop.f32.mrb[9].mxu0 }
 0xc61   :  { %v450_v45 = vpop.f32.mrb[10].mxu0 }
 0xc62   :  { %v822_v46 = vmul.f32 -1.442695, %v453_v43  ;;  %v901_v47 = vpop.f32.mrb[11].mxu0 }
 0xc63   :  { %v634_v47 = vunpack.c.h.bf16 %v557_v24 }
 0xc64   :  { %973 = vpow2.f32 %v822_v46 }
 0xc6e   :  { %v974_v48 = vpop.eup %973 }
 0xc6f   :  { %v457_v49 = vadd.f32 1.0, %v974_v48 }
 0xc71   :  { %975 = vrcp.f32 %v457_v49 }
 0xc7b   :  { %v976_v50 = vpop.eup %975 }
 0xc7c   :  { %v460_v51 = vmul.f32 %v976_v50, %v1215_v15 }
 0xc7e   :  { %v461_v52 = vadd.f32 %v1220_v17, %v460_v51 }
 0xc80   :  { %464 = vrot.lane.b32.xlu1 %v461_v52, %s1093_s30  ;;  %v462_v55 = vmul.f32 %v461_v52, %v396_v34 }
 0xcf2   :  { %v465_v53 = vpop.permute.xlu1 %464 }
 0xcf3   :  { %v467_v54 = vmul.f32 %v465_v53, %v461_v52 }
 0xcf5   :  { %469 = vrot.lane.b32.xlu0 %v467_v54, %s1099_s8 }
 0xd67   :  { %v470_v56 = vpop.permute.xlu0 %469 }
 0xd68   :  { %v472_v57 = vadd.f32 %v470_v56, %v462_v55 }
 0xd6a   :  { %977 = vtanh.f32 %v472_v57 }
 0xd74   :  { %v978_v58 = vpop.eup %977 }
 0xd75   :  { %475 = vrot.lane.b32.xlu1 %v978_v58, %s1093_s30 }
 0xde7   :  { %v476_v59 = vpop.permute.xlu1 %475 }
 0xde8   :  { %v478_v60 = vmul.f32 %v476_v59, %v461_v52 }
 0xdea   :  { %v479_v61 = vpack.c.bf16 %v478_v60, %v478_v60 }
 0xdec   :  { %484 = vrot.lane.b32.xlu0 %v479_v61, %s1099_s8 }
 0xe5e   :  { %v485_v62 = vpop.permute.xlu0 %484 }
 0xe5f   :  { %907 = vmatmul.mubr.msk.bf16.vlgmr.msra.gmra.mrb[8].mxu1 %vm69_vm2, %v485_v62 }
 0xe60   :  { %919 = vmatpush3.bf16.msra.mxu1 %v1193_v2  ;;  %922 = vmatprep.mubr.msk.bf16.mxu1 %vm1097_vm1, %v1096_v0 }
 0xe61   :  { %920 = vmatprep.subr.bf16.mxu1 %v1096_v0 }
 0xe64   :  { %921 = vmatpush3.bf16.msra.mxu1 %v1196_v3 }
 0xf32   :  { %v523_v1 = vpop.f32.mrb[8].mxu1 }
 0xf33   :  { %v529_v4 = vadd.f32 %v523_v1, %v482_v63  ;;  %v908_v5 = vpop.f32.mrb[9].mxu1  ;;  %v947_v1 = vld [vmem:[#allocation9] sm:$0xff]  }
 0xf34   :  { %v526_v6 = vpop.f32.mrb[10].mxu1 }
 0xf35   :  { %v824_v7 = vmul.f32 -1.442695, %v529_v4  ;;  %v909_v8 = vpop.f32.mrb[11].mxu1  ;;  %v948_v4 = vld [vmem:[#allocation9 + $0x8] sm:$0xff]  }
 0xf37   :  { %979 = vpow2.f32 %v824_v7 }
 0xf41   :  { %v980_v9 = vpop.eup %979 }
 0xf42   :  { %v533_v10 = vadd.f32 1.0, %v980_v9  ;;  %v830_v9 = vld [vmem:[%s1333_s4] ss:$0 sm:$0xff] }
 0xf44   :  { %981 = vrcp.f32 %v533_v10 }
 0xf4e   :  { %v982_v11 = vpop.eup %981 }
 0xf4f   :  { %v536_v2 = vmul.f32 %v982_v11, %v1215_v15 }
 0xf51   :  { %v537_v12 = vadd.f32 %v1220_v17, %v536_v2 }
 0xf53   :  { %540 = vrot.lane.b32.xlu1 %v537_v12, %s1093_s30  ;;  %v538_v14 = vmul.f32 %v537_v12, %v472_v57 }
 0xfc5   :  { %v541_v13 = vpop.permute.xlu1 %540 }
 0xfc6   :  { %v543_v3 = vmul.f32 %v541_v13, %v537_v12 }
 0xfc8   :  { %545 = vrot.lane.b32.xlu0 %v543_v3, %s1099_s8 }
0x103a   :  { %v546_v16 = vpop.permute.xlu0 %545 }
0x103b   :  { %v548_v18 = vadd.f32 %v546_v16, %v538_v14 }
0x103d   :  { %983 = vtanh.f32 %v548_v18 }
0x1047   :  { %v984_v19 = vpop.eup %983 }
0x1048   :  { %551 = vrot.lane.b32.xlu1 %v984_v19, %s1093_s30 }
0x10ba   :  { %v552_v20 = vpop.permute.xlu1 %551 }
0x10bb   :  { %v554_v21 = vmul.f32 %v552_v20, %v537_v12 }
0x10bd   :  { %v555_v22 = vpack.c.bf16 %v554_v21, %v554_v21 }
0x10bf   :  { %560 = vrot.lane.b32.xlu0 %v555_v22, %s1099_s8 }
0x1131   :  { %v561_v23 = vpop.permute.xlu0 %560 }
0x1132   :  { %915 = vmatmul.mubr.msk.bf16.vlgmr.msra.gmra.mrb[12].mxu0 %vm69_vm2, %v561_v23 }
0x1133   :  { %930 = vmatprep.mubr.msk.bf16.mxu0 %vm1097_vm1, %v1096_v0  ;;  %927 = vmatpush3.bf16.msra.mxu0 %v947_v1 }
0x1134   :  { %928 = vmatprep.subr.bf16.mxu0 %v1096_v0 }
0x1137   :  { %929 = vmatpush3.bf16.msra.mxu0 %v948_v4 }
0x1205   :  { %v599_v26 = vpop.f32.mrb[12].mxu0 }
0x1206   :  { %v605_v27 = vadd.f32 %v599_v26, %v558_v25  ;;  %v916_v28 = vpop.f32.mrb[13].mxu0 }
0x1207   :  { %v602_v29 = vpop.f32.mrb[14].mxu0 }
0x1208   :  { %v826_v30 = vmul.f32 -1.442695, %v605_v27  ;;  %v917_v31 = vpop.f32.mrb[15].mxu0 }
0x120a   :  { %985 = vpow2.f32 %v826_v30 }
0x1214   :  { %v986_v32 = vpop.eup %985 }
0x1215   :  { %v609_v33 = vadd.f32 1.0, %v986_v32 }
0x1217   :  { %987 = vrcp.f32 %v609_v33 }
0x1221   :  { %v988_v34 = vpop.eup %987 }
0x1222   :  { %v612_v35 = vmul.f32 %v988_v34, %v1215_v15 }
0x1224   :  { %v613_v36 = vadd.f32 %v1220_v17, %v612_v35 }
0x1226   :  { %616 = vrot.lane.b32.xlu1 %v613_v36, %s1093_s30  ;;  %v614_v39 = vmul.f32 %v613_v36, %v548_v18 }
0x1298   :  { %v617_v37 = vpop.permute.xlu1 %616 }
0x1299   :  { %v619_v38 = vmul.f32 %v617_v37, %v613_v36 }
0x129b   :  { %621 = vrot.lane.b32.xlu0 %v619_v38, %s1099_s8 }
0x130d   :  { %v622_v40 = vpop.permute.xlu0 %621 }
0x130e   :  { %v624_v41 = vadd.f32 %v622_v40, %v614_v39 }
0x1310   :  { %989 = vtanh.f32 %v624_v41 }
0x131a   :  { %v990_v42 = vpop.eup %989 }
0x131b   :  { %627 = vrot.lane.b32.xlu1 %v990_v42, %s1093_s30 }
0x138d   :  { %v628_v43 = vpop.permute.xlu1 %627 }
0x138e   :  { %v630_v44 = vmul.f32 %v628_v43, %v613_v36 }
0x1390   :  { %v631_v45 = vpack.c.bf16 %v630_v44, %v630_v44 }
0x1392   :  { %636 = vrot.lane.b32.xlu0 %v631_v45, %s1099_s8 }
0x1404   :  { %v637_v46 = vpop.permute.xlu0 %636 }
0x1405   :  { %923 = vmatmul.mubr.msk.bf16.vlgmr.msra.gmra.mrb[12].mxu1 %vm69_vm2, %v637_v46 }
0x14d8   :  { %v675_v48 = vpop.f32.mrb[12].mxu1 }
0x14d9   :  { %v681_v49 = vadd.f32 %v675_v48, %v634_v47  ;;  %v924_v50 = vpop.f32.mrb[13].mxu1 }
0x14da   :  { %v678_v51 = vpop.f32.mrb[14].mxu1 }
0x14db   :  { %v828_v52 = vmul.f32 -1.442695, %v681_v49  ;;  %v925_v53 = vpop.f32.mrb[15].mxu1 }
0x14dd   :  { %991 = vpow2.f32 %v828_v52 }
0x14e7   :  { %v992_v54 = vpop.eup %991 }
0x14e8   :  { %v685_v55 = vadd.f32 1.0, %v992_v54 }
0x14ea   :  { %993 = vrcp.f32 %v685_v55 }
0x14f4   :  { %v994_v56 = vpop.eup %993 }
0x14f5   :  { %v688_v57 = vmul.f32 %v994_v56, %v1215_v15 }
0x14f7   :  { %v689_v58 = vadd.f32 %v1220_v17, %v688_v57 }
0x14f9   :  { %692 = vrot.lane.b32.xlu1 %v689_v58, %s1093_s30  ;;  %v690_v61 = vmul.f32 %v689_v58, %v624_v41 }
0x156b   :  { %v693_v59 = vpop.permute.xlu1 %692 }
0x156c   :  { %v695_v60 = vmul.f32 %v693_v59, %v689_v58 }
0x156e   :  { %697 = vrot.lane.b32.xlu0 %v695_v60, %s1099_s8 }
0x15e0   :  { %v698_v62 = vpop.permute.xlu0 %697 }
0x15e1   :  { %v700_v63 = vadd.f32 %v698_v62, %v690_v61 }
0x15e3   :  { %995 = vtanh.f32 %v700_v63 }
0x15ed   :  { %v996_v5 = vpop.eup %995 }
0x15ee   :  { %703 = vrot.lane.b32.xlu1 %v996_v5, %s1093_s30 }
0x1660   :  { %v704_v15 = vpop.permute.xlu1 %703 }
0x1661   :  { %v706_v17 = vmul.f32 %v704_v15, %v689_v58 }
0x1663   :  { %v707_v6 = vpack.c.bf16 %v706_v17, %v706_v17 }
0x1665   :  { %711 = vrot.lane.b32.xlu1 %v707_v6, %s1099_s8  ;;  %735 = vrot.lane.b32.xlu0 %v707_v6, %s1099_s8 }
0x1669   :  { %717 = vrot.lane.b32.xlu0 %v700_v63, %s1100_s2 }
0x16d7   :  { %v712_v7 = vpop.permute.xlu1 %711  ;;  %v736_v8 = vpop.permute.xlu0 %735 }
0x16d8   :  { %715 = vst.msk [vmem:[#allocation2] sm:$0xf] %vm67_vm0, %v712_v7  ;;  %931 = vmatmul.mubr.msk.bf16.vlgmr.msra.gmra.mrb[16].mxu0 %vm69_vm2, %v736_v8 }
0x16db   :  { %v718_v0 = vpop.permute.xlu0 %717 }
0x16dc   :  { %720 = vst.msk [vmem:[#allocation3] sm:$0xff] %vm69_vm2, %v718_v0 }
0x17ab   :  { %v786_v10 = vpop.f32.mrb[16].mxu0 }
0x17ac   :  { %v787_v11 = vadd.f32 %v830_v9, %v786_v10  ;;  %v932_v2 = vpop.f32.mrb[17].mxu0 }
0x17ad   :  { %v789_v12 = vpop.f32.mrb[18].mxu0 }
0x17ae   :  { %792 = vst [vmem:[#allocation10] sm:$0xff] %v787_v11  ;;  %v933_v13 = vpop.f32.mrb[19].mxu0 }
0x17af   :  { %1074 = shalt.err (!%p1071_p0)
}
0x17b0   :  { %s1075_s4 = scalar_lea.hbm %s1334_s5, 128 }
0x17b1   :  { %p1076_p1 = scmp.ne.s32.totalorder %s1334_s5, %s1075_s4  ;;  %p1079_p2 = scmp.lt.u32.totalorder %s1075_s4, %s1334_s5 }
0x17b3   :  { %p1081_p3 = pnand %p1079_p2, %p1076_p1 }
0x17b5   :  { %1084 = shalt.err (!%p1081_p3)
}
0x17b6   :  { %802 = dma.vmem_to_hbm [thread:$0]  %s800_s11, 128, %s1334_s5, [#allocation6]  }
0x17b7   :  { %1089 = dma.done.wait [#allocation6], 128  }
0x17b8   :  { %1090 = vsyncadd [#allocation6], 4294967168 }
0x17b9   :  { %806 = vsyncpa [#allocation5], 1 }
0x17ba   :  { %807 = vsyncpa [#allocation8], 1 }
0x17bb   :  { %808 = vsyncpa [#allocation6], 1 }

</bundles_post_ra>
